<compile_context>
chip_gen: v5e
topology: v5e:2x2
jax: 0.10.0
libtpu: 0.0.40
codegen_flags: <defaults>
</compile_context>

<pallas_src>
import functools
import math

import jax
import jax.numpy as jnp
from jax.experimental import pallas as pl
from jax.experimental.pallas import tpu as pltpu


def _fbeta_counts_kernel(logit_ref, label_ref, tp_out, p_out, t_out,
                         tp_acc, p_acc, t_acc, *,
                         thr_logit, label_is_int, label_thr, threshold,
                         view_rows, tile_r, tiles_per_split, mask_needed):
    s = pl.program_id(0)          # TensorCore split (parallel axis)
    j = pl.program_id(1)          # tile index within this split (reduction axis)

    @pl.when(j == 0)
    def _init():
        tp_acc[...] = jnp.zeros_like(tp_acc)
        p_acc[...] = jnp.zeros_like(p_acc)
        t_acc[...] = jnp.zeros_like(t_acc)

    x = logit_ref[...]            # native dtype (bf16/f32/...), no upcast
    y = label_ref[...]            # native dtype (int8/int32/float)

    # sigmoid(x) >= thr  <=>  x >= log(thr/(1-thr))  (sigmoid folded away).
    pred = x >= thr_logit
    if label_is_int:
        true = y.astype(jnp.int32) >= label_thr     # label >= ceil(thr)
    else:
        true = y.astype(jnp.float32) >= threshold

    def _accumulate(p, t):
        pt = jnp.logical_and(p, t)
        # Sublane-only reductions into lane-wide exact int32 accumulators.
        tp_acc[...] += jnp.sum(pt.astype(jnp.int32), axis=0, keepdims=True)
        p_acc[...] += jnp.sum(p.astype(jnp.int32), axis=0, keepdims=True)
        t_acc[...] += jnp.sum(t.astype(jnp.int32), axis=0, keepdims=True)

    if mask_needed:
        # Only tiles overhanging the real row range pay for the mask
        # (covers both the ragged last tile and clamped overflow tiles).
        tile_start = (s * tiles_per_split + j) * tile_r
        is_partial = tile_start + tile_r > view_rows

        @pl.when(jnp.logical_not(is_partial))
        def _full():
            _accumulate(pred, true)

        @pl.when(is_partial)
        def _masked():
            row_ids = tile_start + jax.lax.broadcasted_iota(jnp.int32, pred.shape, 0)
            valid = row_ids < view_rows
            _accumulate(jnp.logical_and(pred, valid), jnp.logical_and(true, valid))
    else:
        _accumulate(pred, true)

    @pl.when(j == tiles_per_split - 1)
    def _writeback():
        tp_out[0] = tp_acc[...]
        p_out[0] = p_acc[...]
        t_out[0] = t_acc[...]


def _sublane_multiple(dtype):
    itemsize = jnp.dtype(dtype).itemsize
    return 8 * max(1, 4 // itemsize)     # 8 for 32-bit, 16 for 16-bit, 32 for 8-bit


def _vmem_capacity_bytes():
    try:
        cap = getattr(pltpu.get_tpu_info(), "vmem_capacity_bytes", None)
        if cap:
            return int(cap)
    except Exception:
        pass
    return 64 << 20                      # conservative (v7x-sized) fallback


def _num_tensorcores():
    try:
        info = pltpu.get_tpu_info()
        for name in ("num_cores", "core_count", "num_tensorcores",
                     "cores_per_chip", "tensorcores_per_chip"):
            v = getattr(info, name, None)
            if v is not None:
                v = int(v)
                if 1 <= v <= 8:
                    return v
    except Exception:
        pass
    try:
        v = int(getattr(jax.devices()[0], "num_cores", 1))
        if 1 <= v <= 8:
            return v
    except Exception:
        pass
    return 1


def _choose_2d_view(rows, n):
    """Lane-dense (rows2, width) re-view of the flattened elements (free reshape)."""
    total = rows * n
    if n % 128 == 0 and 128 <= n <= 2048:
        return rows, n
    for width in (2048, 1024, 512, 256, 128):
        if total % width == 0 and total >= width:
            return total // width, width
    return rows, n                       # fallback: padded lanes, still correct


def binary_fbeta_score(logit, label, *, beta=1.0, threshold=0.5, average="macro",
                       tile_r=None, split=None):
    """Pallas BinaryFBetaScore. logit/label: same shape. Returns f32 scalar."""
    if average != "macro":
        # Mirrors the PyTorch module: micro/weighted are not implemented.
        raise NotImplementedError(f"average={average!r} not implemented")
    assert logit.shape == label.shape, "logit and label must have the same shape"

    if logit.size == 0:
        return jnp.float32(0.0)

    # Dtype handling: stream native dtypes; bool labels as int8 (1B/elem).
    if label.dtype == jnp.bool_:
        label = label.astype(jnp.int8)
    elif label.dtype == jnp.int64:
        label = label.astype(jnp.int32)
    if not jnp.issubdtype(logit.dtype, jnp.floating):
        logit = logit.astype(jnp.float32)
    label_is_int = bool(jnp.issubdtype(label.dtype, jnp.integer))

    thr = float(threshold)
    if thr <= 0.0:
        thr_logit = float("-inf")
    elif thr >= 1.0:
        thr_logit = float("inf")
    else:
        thr_logit = math.log(thr / (1.0 - thr))
    label_thr = int(min(max(math.ceil(thr), -(2 ** 31)), 2 ** 31 - 1))

    # Lane-dense 2D view of the flattened elements (the sum is order-invariant).
    shape = logit.shape
    if len(shape) <= 1:
        rows0, n0 = 1, (int(shape[0]) if len(shape) == 1 else 1)
    else:
        n0 = int(shape[-1])
        rows0 = 1
        for d in shape[:-1]:
            rows0 *= int(d)
    view_rows, width = _choose_2d_view(rows0, n0)
    logit2 = logit.reshape(view_rows, width)
    label2 = label.reshape(view_rows, width)

    li = jnp.dtype(logit2.dtype).itemsize
    la = jnp.dtype(label2.dtype).itemsize
    sub = max(_sublane_multiple(logit2.dtype), _sublane_multiple(label2.dtype))

    # Tile sizing against the chip's VMEM (double-buffered native-dtype inputs).
    cap = _vmem_capacity_bytes()
    budget = (28 << 20) if cap >= (100 << 20) else (16 << 20)
    row_bytes = width * (li + la)
    if tile_r is None:
        max_rows = budget // (2 * max(row_bytes, 1))
        tile_r = int(min(view_rows, max(sub, (max_rows // sub) * sub)))
    else:
        tile_r = int(min(max(int(tile_r), 1), view_rows))
    if tile_r < view_rows:
        # Round user/auto tile to the dtype sublane multiple (full dim is always legal).
        tile_r = min(view_rows, max(sub, (tile_r // sub) * sub))

    num_tiles = -(-view_rows // tile_r)

    # Split the tile range over TensorCores (v7x); 1-core chips keep split=1.
    if split is None:
        split = min(_num_tensorcores(), 2)
    split = max(1, min(int(split), num_tiles))
    tiles_per_split = -(-num_tiles // split)
    mask_needed = split * tiles_per_split * tile_r != view_rows

    def in_index(s, j):
        t = s * tiles_per_split + j
        return (jnp.minimum(t, num_tiles - 1), 0)    # clamp overflow tiles (masked in kernel)

    def out_index(s, j):
        return (s, 0, 0)

    step_bytes = tile_r * row_bytes
    vmem_limit = int(min(max(2 * step_bytes + (4 << 20), 16 << 20),
                         max(int(0.85 * cap), 32 << 20)))

    kernel = functools.partial(
        _fbeta_counts_kernel,
        thr_logit=thr_logit, label_is_int=label_is_int, label_thr=label_thr,
        threshold=thr, view_rows=view_rows, tile_r=tile_r,
        tiles_per_split=tiles_per_split, mask_needed=mask_needed)

    count_shape = jax.ShapeDtypeStruct((split, 1, width), jnp.int32)
    tp_c, p_c, t_c = pl.pallas_call(
        kernel,
        out_shape=(count_shape, count_shape, count_shape),
        grid_spec=pltpu.PrefetchScalarGridSpec(
            num_scalar_prefetch=0,
            grid=(split, tiles_per_split),
            in_specs=[pl.BlockSpec((tile_r, width), in_index),
                      pl.BlockSpec((tile_r, width), in_index)],
            out_specs=[pl.BlockSpec((1, 1, width), out_index)] * 3,
            scratch_shapes=[pltpu.VMEM((1, width), jnp.int32)] * 3,
        ),
        compiler_params=pltpu.CompilerParams(
            dimension_semantics=("parallel", "arbitrary"),
            vmem_limit_bytes=vmem_limit),
    )(logit2, label2)

    # Tiny scalar epilogue in plain JAX on exact integer counts.
    tp = jnp.sum(tp_c).astype(jnp.float32)
    pc = jnp.sum(p_c).astype(jnp.float32)
    tc = jnp.sum(t_c).astype(jnp.float32)
    fp = pc - tp
    fn = tc - tp
    eps = jnp.float32(1e-7)
    precision = tp / (tp + fp + eps)
    recall = tp / (tp + fn + eps)
    b2 = jnp.float32(float(beta) ** 2)
    return (1.0 + b2) * precision * recall / (b2 * precision + recall + eps)


def _reference(logit, label, beta=1.0, threshold=0.5):
    # Pure-JAX reference mirroring the PyTorch forward (macro).
    pred = (jax.nn.sigmoid(logit.astype(jnp.float32)) >= threshold).astype(jnp.float32)
    true = (label.astype(jnp.float32) >= threshold).astype(jnp.float32)
    tp = jnp.sum(pred * true)
    fp = jnp.sum(pred * (1.0 - true))
    fn = jnp.sum((1.0 - pred) * true)
    precision = tp / (tp + fp + 1e-7)
    recall = tp / (tp + fn + 1e-7)
    return (1.0 + beta ** 2) * precision * recall / (beta ** 2 * precision + recall + 1e-7)


if __name__ == "__main__":
    key = jax.random.PRNGKey(0)
    k1, k2, k3, k4 = jax.random.split(key, 4)

    # 1) f32 logits / int32 labels, last dim not lane aligned (fallback 2D view).
    logits = jax.random.normal(k1, (24, 200), dtype=jnp.float32)
    labels = jax.random.randint(k2, (24, 200), 0, 2, dtype=jnp.int32)
    ref = _reference(logits, labels)
    score = binary_fbeta_score(logits, labels)
    jax.block_until_ready(score)
    assert jnp.allclose(score, ref, atol=1e-6), (score, ref)

    # 2) Multi-tile + forced 2-way TensorCore split (exercises the clamped
    #    overflow tile and the last-tile-only row mask).
    score_split = binary_fbeta_score(logits, labels, tile_r=8, split=2)
    jax.block_until_ready(score_split)
    assert jnp.allclose(score_split, ref, atol=1e-6), (score_split, ref)

    # 3) bf16 logits + bool labels, 3D input -> lane-dense (3, 512) view, int8 labels.
    logits3 = jax.random.normal(k3, (2, 8, 96), dtype=jnp.bfloat16)
    labels3 = jax.random.bernoulli(k4, 0.5, (2, 8, 96))
    ref3 = _reference(logits3, labels3)
    score3 = binary_fbeta_score(logits3, labels3)
    jax.block_until_ready(score3)
    assert jnp.allclose(score3, ref3, atol=1e-6), (score3, ref3)

    print("KERNEL_OK")
</pallas_src>

<mosaic_0001>
module attributes {stable_mosaic.version = 11 : i64} {
  func.func @_fbeta_counts_kernel(%arg0: i32, %arg1: i32, %arg2: memref<24x200xf32, #tpu.memory_space<vmem>>, %arg3: memref<24x200xi32, #tpu.memory_space<vmem>>, %arg4: memref<1x1x200xi32, #tpu.memory_space<vmem>>, %arg5: memref<1x1x200xi32, #tpu.memory_space<vmem>>, %arg6: memref<1x1x200xi32, #tpu.memory_space<vmem>>, %arg7: memref<1x200xi32, #tpu.memory_space<vmem>>, %arg8: memref<1x200xi32, #tpu.memory_space<vmem>>, %arg9: memref<1x200xi32, #tpu.memory_space<vmem>>) attributes {dimension_semantics = [#tpu.dimension_semantics<parallel>, #tpu.dimension_semantics<arbitrary>], iteration_bounds = array<i64: 1, 1>, scalar_prefetch = 0 : i64, scratch_operands = 3 : i64, tpu.core_type = #tpu.core_type<tc>, window_params = [{transform_indices = @transform_0, window_bounds = array<i64: 24, 200>}, {transform_indices = @transform_1, window_bounds = array<i64: 24, 200>}, {transform_indices = @transform_2, window_bounds = array<i64: 1, 1, 200>}, {transform_indices = @transform_3, window_bounds = array<i64: 1, 1, 200>}, {transform_indices = @transform_4, window_bounds = array<i64: 1, 1, 200>}]} {
    %c0_i32 = arith.constant 0 : i32
    %0 = arith.cmpi eq, %arg1, %c0_i32 : i32
    %1 = arith.extui %0 : i1 to i32
    %c0_i32_0 = arith.constant 0 : i32
    %2 = arith.cmpi ne, %1, %c0_i32_0 : i32
    scf.if %2 {
      %c0_i32_21 = arith.constant 0 : i32
      %31 = vector.broadcast %c0_i32_21 : i32 to vector<1x200xi32>
      %c0_22 = arith.constant 0 : index
      %c0_23 = arith.constant 0 : index
      %32 = vector.load %arg7[%c0_22, %c0_23] : memref<1x200xi32, #tpu.memory_space<vmem>>, vector<1x200xi32>
      tpu.vector_store %arg7[%c0_22, %c0_23], %31 {strides = array<i32>} : memref<1x200xi32, #tpu.memory_space<vmem>>, vector<1x200xi32>,
      %c0_i32_24 = arith.constant 0 : i32
      %33 = vector.broadcast %c0_i32_24 : i32 to vector<1x200xi32>
      %c0_25 = arith.constant 0 : index
      %c0_26 = arith.constant 0 : index
      %34 = vector.load %arg8[%c0_25, %c0_26] : memref<1x200xi32, #tpu.memory_space<vmem>>, vector<1x200xi32>
      tpu.vector_store %arg8[%c0_25, %c0_26], %33 {strides = array<i32>} : memref<1x200xi32, #tpu.memory_space<vmem>>, vector<1x200xi32>,
      %c0_i32_27 = arith.constant 0 : i32
      %35 = vector.broadcast %c0_i32_27 : i32 to vector<1x200xi32>
      %c0_28 = arith.constant 0 : index
      %c0_29 = arith.constant 0 : index
      %36 = vector.load %arg9[%c0_28, %c0_29] : memref<1x200xi32, #tpu.memory_space<vmem>>, vector<1x200xi32>
      tpu.vector_store %arg9[%c0_28, %c0_29], %35 {strides = array<i32>} : memref<1x200xi32, #tpu.memory_space<vmem>>, vector<1x200xi32>,
    } else {
    }
    %c0 = arith.constant 0 : index
    %c0_1 = arith.constant 0 : index
    %3 = vector.load %arg2[%c0, %c0_1] : memref<24x200xf32, #tpu.memory_space<vmem>>, vector<24x200xf32>
    %c0_2 = arith.constant 0 : index
    %c0_3 = arith.constant 0 : index
    %4 = vector.load %arg3[%c0_2, %c0_3] : memref<24x200xi32, #tpu.memory_space<vmem>>, vector<24x200xi32>
    %cst = arith.constant 0.000000e+00 : f32
    %5 = vector.broadcast %cst : f32 to vector<24x200xf32>
    %6 = arith.cmpf oge, %3, %5 : vector<24x200xf32>
    %c1_i32 = arith.constant 1 : i32
    %7 = vector.broadcast %c1_i32 : i32 to vector<24x200xi32>
    %8 = arith.cmpi sge, %4, %7 : vector<24x200xi32>
    %9 = arith.andi %6, %8 : vector<24x200xi1>
    %c0_4 = arith.constant 0 : index
    %c0_5 = arith.constant 0 : index
    %10 = vector.load %arg7[%c0_4, %c0_5] : memref<1x200xi32, #tpu.memory_space<vmem>>, vector<1x200xi32>
    %11 = arith.extui %9 : vector<24x200xi1> to vector<24x200xi32>
    %cst_6 = arith.constant dense<0> : vector<200xi32>
    %12 = vector.multi_reduction <add>, %11, %cst_6 [0] : vector<24x200xi32> to vector<200xi32>
    %13 = vector.shape_cast %12 : vector<200xi32> to vector<1x200xi32>
    %14 = arith.addi %10, %13 : vector<1x200xi32>
    %c0_7 = arith.constant 0 : index
    %c0_8 = arith.constant 0 : index
    %15 = vector.load %arg7[%c0_7, %c0_8] : memref<1x200xi32, #tpu.memory_space<vmem>>, vector<1x200xi32>
    tpu.vector_store %arg7[%c0_7, %c0_8], %14 {strides = array<i32>} : memref<1x200xi32, #tpu.memory_space<vmem>>, vector<1x200xi32>,
    %c0_9 = arith.constant 0 : index
    %c0_10 = arith.constant 0 : index
    %16 = vector.load %arg8[%c0_9, %c0_10] : memref<1x200xi32, #tpu.memory_space<vmem>>, vector<1x200xi32>
    %17 = arith.extui %6 : vector<24x200xi1> to vector<24x200xi32>
    %cst_11 = arith.constant dense<0> : vector<200xi32>
    %18 = vector.multi_reduction <add>, %17, %cst_11 [0] : vector<24x200xi32> to vector<200xi32>
    %19 = vector.shape_cast %18 : vector<200xi32> to vector<1x200xi32>
    %20 = arith.addi %16, %19 : vector<1x200xi32>
    %c0_12 = arith.constant 0 : index
    %c0_13 = arith.constant 0 : index
    %21 = vector.load %arg8[%c0_12, %c0_13] : memref<1x200xi32, #tpu.memory_space<vmem>>, vector<1x200xi32>
    tpu.vector_store %arg8[%c0_12, %c0_13], %20 {strides = array<i32>} : memref<1x200xi32, #tpu.memory_space<vmem>>, vector<1x200xi32>,
    %c0_14 = arith.constant 0 : index
    %c0_15 = arith.constant 0 : index
    %22 = vector.load %arg9[%c0_14, %c0_15] : memref<1x200xi32, #tpu.memory_space<vmem>>, vector<1x200xi32>
    %23 = arith.extui %8 : vector<24x200xi1> to vector<24x200xi32>
    %cst_16 = arith.constant dense<0> : vector<200xi32>
    %24 = vector.multi_reduction <add>, %23, %cst_16 [0] : vector<24x200xi32> to vector<200xi32>
    %25 = vector.shape_cast %24 : vector<200xi32> to vector<1x200xi32>
    %26 = arith.addi %22, %25 : vector<1x200xi32>
    %c0_17 = arith.constant 0 : index
    %c0_18 = arith.constant 0 : index
    %27 = vector.load %arg9[%c0_17, %c0_18] : memref<1x200xi32, #tpu.memory_space<vmem>>, vector<1x200xi32>
    tpu.vector_store %arg9[%c0_17, %c0_18], %26 {strides = array<i32>} : memref<1x200xi32, #tpu.memory_space<vmem>>, vector<1x200xi32>,
    %c0_i32_19 = arith.constant 0 : i32
    %28 = arith.cmpi eq, %arg1, %c0_i32_19 : i32
    %29 = arith.extui %28 : i1 to i32
    %c0_i32_20 = arith.constant 0 : i32
    %30 = arith.cmpi ne, %29, %c0_i32_20 : i32
    scf.if %30 {
      %c0_21 = arith.constant 0 : index
      %c0_22 = arith.constant 0 : index
      %31 = vector.load %arg7[%c0_21, %c0_22] : memref<1x200xi32, #tpu.memory_space<vmem>>, vector<1x200xi32>
      %c0_23 = arith.constant 0 : index
      %c0_24 = arith.constant 0 : index
      %c0_25 = arith.constant 0 : index
      %32 = vector.load %arg4[%c0_23, %c0_24, %c0_25] : memref<1x1x200xi32, #tpu.memory_space<vmem>>, vector<1x1x200xi32>
      %33 = vector.shape_cast %32 : vector<1x1x200xi32> to vector<1x200xi32>
      %34 = vector.shape_cast %31 : vector<1x200xi32> to vector<1x1x200xi32>
      tpu.vector_store %arg4[%c0_23, %c0_24, %c0_25], %34 {strides = array<i32>} : memref<1x1x200xi32, #tpu.memory_space<vmem>>, vector<1x1x200xi32>,
      %c0_26 = arith.constant 0 : index
      %c0_27 = arith.constant 0 : index
      %35 = vector.load %arg8[%c0_26, %c0_27] : memref<1x200xi32, #tpu.memory_space<vmem>>, vector<1x200xi32>
      %c0_28 = arith.constant 0 : index
      %c0_29 = arith.constant 0 : index
      %c0_30 = arith.constant 0 : index
      %36 = vector.load %arg5[%c0_28, %c0_29, %c0_30] : memref<1x1x200xi32, #tpu.memory_space<vmem>>, vector<1x1x200xi32>
      %37 = vector.shape_cast %36 : vector<1x1x200xi32> to vector<1x200xi32>
      %38 = vector.shape_cast %35 : vector<1x200xi32> to vector<1x1x200xi32>
      tpu.vector_store %arg5[%c0_28, %c0_29, %c0_30], %38 {strides = array<i32>} : memref<1x1x200xi32, #tpu.memory_space<vmem>>, vector<1x1x200xi32>,
      %c0_31 = arith.constant 0 : index
      %c0_32 = arith.constant 0 : index
      %39 = vector.load %arg9[%c0_31, %c0_32] : memref<1x200xi32, #tpu.memory_space<vmem>>, vector<1x200xi32>
      %c0_33 = arith.constant 0 : index
      %c0_34 = arith.constant 0 : index
      %c0_35 = arith.constant 0 : index
      %40 = vector.load %arg6[%c0_33, %c0_34, %c0_35] : memref<1x1x200xi32, #tpu.memory_space<vmem>>, vector<1x1x200xi32>
      %41 = vector.shape_cast %40 : vector<1x1x200xi32> to vector<1x200xi32>
      %42 = vector.shape_cast %39 : vector<1x200xi32> to vector<1x1x200xi32>
      tpu.vector_store %arg6[%c0_33, %c0_34, %c0_35], %42 {strides = array<i32>} : memref<1x1x200xi32, #tpu.memory_space<vmem>>, vector<1x1x200xi32>,
    } else {
    }
    return
  }
  func.func @transform_0(%arg0: i32, %arg1: i32) -> (i32, i32) {
    %c1_i32 = arith.constant 1 : i32
    %0 = arith.muli %arg0, %c1_i32 : i32
    %1 = arith.addi %0, %arg1 : i32
    %c0_i32 = arith.constant 0 : i32
    %2 = arith.minsi %1, %c0_i32 : i32
    %c0_i32_0 = arith.constant 0 : i32
    %c0_i32_1 = arith.constant 0 : i32
    return %2, %c0_i32_0 : i32, i32
  }
  func.func @transform_1(%arg0: i32, %arg1: i32) -> (i32, i32) {
    %c1_i32 = arith.constant 1 : i32
    %0 = arith.muli %arg0, %c1_i32 : i32
    %1 = arith.addi %0, %arg1 : i32
    %c0_i32 = arith.constant 0 : i32
    %2 = arith.minsi %1, %c0_i32 : i32
    %c0_i32_0 = arith.constant 0 : i32
    %c0_i32_1 = arith.constant 0 : i32
    return %2, %c0_i32_0 : i32, i32
  }
  func.func @transform_2(%arg0: i32, %arg1: i32) -> (i32, i32, i32) {
    %c0_i32 = arith.constant 0 : i32
    %c0_i32_0 = arith.constant 0 : i32
    %c0_i32_1 = arith.constant 0 : i32
    return %arg0, %c0_i32, %c0_i32_0 : i32, i32, i32
  }
  func.func @transform_3(%arg0: i32, %arg1: i32) -> (i32, i32, i32) {
    %c0_i32 = arith.constant 0 : i32
    %c0_i32_0 = arith.constant 0 : i32
    %c0_i32_1 = arith.constant 0 : i32
    return %arg0, %c0_i32, %c0_i32_0 : i32, i32, i32
  }
  func.func @transform_4(%arg0: i32, %arg1: i32) -> (i32, i32, i32) {
    %c0_i32 = arith.constant 0 : i32
    %c0_i32_0 = arith.constant 0 : i32
    %c0_i32_1 = arith.constant 0 : i32
    return %arg0, %c0_i32, %c0_i32_0 : i32, i32, i32
  }
}

</mosaic_0001>

<bundles_post_ra>
// kernel: tpu_custom_call.1
= control target key start
LH: loop header
LB: loop body
LE: loop exit
PB: predicated region body
PF: predicated region fallthrough
CT: control target
= control target key end

     0   :  { %10 = vsyncpa [#allocation6], 0  ;;  %s526_s0 = inlined_call_operand.hbm [shape: f32[24,200], index: 0, kind: input, shape index: {}]   ;;  %s527_s1 = inlined_call_operand.hbm [shape: s32[24,200], index: 1, kind: input, shape index: {}]   ;;  %s528_s2 = inlined_call_operand.hbm [shape: s32[1,1,200], index: 2, kind: output, shape index: {0}]   ;;  %s529_s3 = inlined_call_operand.hbm [shape: s32[1,1,200], index: 3, kind: output, shape index: {1}]   ;;  %s530_s4 = inlined_call_operand.hbm [shape: s32[1,1,200], index: 4, kind: output, shape index: {2}]  }
   0x1   :  { %11 = vsyncpa [#allocation9], 0 }
   0x2   :  { %12 = vsyncpa [#allocation7], 0 }
   0x3   :  { %13 = vsyncpa [#allocation12], 0  ;;  %s25_s17 = sshll.u32 %s526_s0, 4  ;;  %s405_s18 = smov [#allocation5]   ;;  %s26_s17 = int_to_ptr.hbm [resolvable:$true] %s25_s17 }
   0x4   :  { %s27_s19 = sshll.u32 %s405_s18, 4  ;;  %s45_s22 = sshll.u32 %s527_s1, 4  ;;  %s28_s19 = int_to_ptr.vmem [resolvable:$true] %s27_s19  ;;  %s46_s22 = int_to_ptr.hbm [resolvable:$true] %s45_s22 }
   0x5   :  { %s406_s23 = smov 256   ;;  %s407_s24 = smov 16  }
   0x6   :  { %33 = dma.hbm_to_vmem [thread:$0]  %s26_s17, 768, %s28_s19, [#allocation6], %s406_s23, %s406_s23, %s407_s24  }
   0x7   :  { %s408_s25 = smov [#allocation8]  }
   0x8   :  { %s47_s26 = sshll.u32 %s408_s25, 4  ;;  %s48_s26 = int_to_ptr.vmem [resolvable:$true] %s47_s26 }
   0x9   :  { %53 = dma.hbm_to_vmem [thread:$0]  %s46_s22, 768, %s48_s26, [#allocation9], %s406_s23, %s406_s23, %s407_s24  }
   0xa   :  { %397 = dma.done.wait [#allocation6], 768  }
   0xb   :  { %398 = vsyncadd [#allocation6], 4294966528 }
   0xc   :  { %399 = dma.done.wait [#allocation9], 768  }
   0xd   :  { %400 = vsyncadd [#allocation9], 4294966528  ;;  %v74_v0 = vlaneseq  ;;  %v409_v2 = vmov 0   ;;  %v81_v3 = vld [vmem:[#allocation5] sm:$0xff]  ;;  %v82_v4 = vld [vmem:[#allocation5 + $0x8] sm:$0xff]  ;;  %vm126_vm1 = vcmask 588800  }
   0xe   :  { %v83_v5 = vld [vmem:[#allocation5 + $0x10] sm:$0xff]  ;;  %v84_v6 = vld [vmem:[#allocation5 + $0x18] sm:$0xff]  ;;  %v85_v7 = vld [vmem:[#allocation5 + $0x20] sm:$0xff]  ;;  %vm93_vm2 = vcmp.ge.f32.partialorder %v81_v3, 0.0  ;;  %vm94_vm3 = vcmp.ge.f32.partialorder %v82_v4, 0.0  ;;  %s410_s0 = smov [#allocation11]  }
   0xf   :  { %vm444_vm0 = vcmp.lt.s32.totalorder %v74_v0, 200  ;;  %v86_v8 = vld [vmem:[#allocation5 + $0x28] sm:$0xff]  ;;  %vm95_vm4 = vcmp.ge.f32.partialorder %v83_v5, 0.0  ;;  %vm96_vm5 = vcmp.ge.f32.partialorder %v84_v6, 0.0  ;;  %vm97_vm6 = vcmp.ge.f32.partialorder %v85_v7, 0.0  ;;  %v87_v10 = vld [vmem:[#allocation8] sm:$0xff] }
  0x10   :  { %79 = vst.msk [vmem:[#allocation3] sm:$0x3] %vm444_vm0, %v409_v2  ;;  %vm531_vm7 = vcmp.ge.f32.partialorder %v86_v8, 0.0  ;;  %v148_v9 = vsel %vm93_vm2, 1, %v409_v2  ;;  %v88_v11 = vld [vmem:[#allocation8 + $0x8] sm:$0xff]  ;;  %v149_v12 = vsel %vm94_vm3, 1, %v409_v2 }
  0x11   :  { %78 = vst.msk [vmem:[#allocation2] sm:$0x3] %vm444_vm0, %v409_v2  ;;  %v150_v13 = vsel %vm95_vm4, 1, %v409_v2  ;;  %v151_v14 = vsel %vm96_vm5, 1, %v409_v2  ;;  %v152_v15 = vsel %vm97_vm6, 1, %v409_v2  ;;  %v153_v16 = vsel %vm531_vm7, 1, %v409_v2 }
  0x12   :  { %80 = vst.msk [vmem:[#allocation4] sm:$0x3] %vm444_vm0, %v409_v2  ;;  %v154_v17 = vadd.s32 %v152_v15, %v148_v9  ;;  %v162_v18 = vsel %vm126_vm1, %v149_v12, 0  ;;  %v163_v19 = vsel %vm126_vm1, %v151_v14, 0  ;;  %v89_v20 = vld [vmem:[#allocation8 + $0x10] sm:$0xff]  ;;  %v90_v21 = vld [vmem:[#allocation8 + $0x18] sm:$0xff] }
  0x13   :  { %v91_v22 = vld [vmem:[#allocation8 + $0x20] sm:$0xff]  ;;  %v164_v23 = vsel %vm126_vm1, %v153_v16, 0  ;;  %v92_v24 = vld [vmem:[#allocation8 + $0x28] sm:$0xff]  ;;  %vm99_vm8 = vcmp.ge.s32.totalorder %v87_v10, 1  ;;  %vm100_vm9 = vcmp.ge.s32.totalorder %v88_v11, 1  ;;  %vm101_vm10 = vcmp.ge.s32.totalorder %v89_v20, 1 }
  0x14   :  { %v155_v25 = vadd.s32 %v154_v17, %v150_v13  ;;  %v165_v26 = vadd.s32 %v164_v23, %v162_v18  ;;  %vm102_vm11 = vcmp.ge.s32.totalorder %v90_v21, 1  ;;  %vm103_vm12 = vcmp.ge.s32.totalorder %v91_v22, 1  ;;  %vm105_vm13 = vmand %vm93_vm2, %vm99_vm8  ;;  %s232_s1 = sshll.u32 %s410_s0, 4  ;;  %s234_s29 = sshll.u32 %s529_s3, 4  ;;  %s233_s1 = int_to_ptr.vmem [resolvable:$true] %s232_s1  ;;  %s235_s29 = int_to_ptr.hbm [resolvable:$true] %s234_s29 }
  0x15   :  { %vm104_vm14 = vcmp.ge.s32.totalorder %v92_v24, 1  ;;  %vm106_vm15 = vmand %vm94_vm3, %vm100_vm9  ;;  %v112_v27 = vsel %vm105_vm13, 1, %v409_v2  ;;  %v178_v28 = vsel %vm99_vm8, 1, %v409_v2  ;;  %v179_v29 = vsel %vm100_vm9, 1, %v409_v2  ;;  %s411_s30 = smov [#allocation10]   ;;  %s223_s7 = sshll.u32 %s528_s2, 4  ;;  %s224_s7 = int_to_ptr.hbm [resolvable:$true] %s223_s7 }
  0x16   :  { %v156_v30 = vrot.slane %v155_v25, 4  ;;  %v166_v31 = vadd.s32 %v165_v26, %v163_v19  ;;  %vm107_vm7 = vmand %vm95_vm4, %vm101_vm10  ;;  %v113_v32 = vsel %vm106_vm15, 1, %v409_v2  ;;  %v180_v33 = vsel %vm101_vm10, 1, %v409_v2  ;;  %s221_s5 = sshll.u32 %s411_s30, 4  ;;  %s412_s8 = smov [#allocation13]   ;;  %s222_s5 = int_to_ptr.vmem [resolvable:$true] %s221_s5 }
  0x17   :  { %vm108_vm2 = vmand %vm96_vm5, %vm102_vm11  ;;  %v114_v34 = vsel %vm107_vm7, 1, %v409_v2  ;;  %v127_v35 = vsel %vm126_vm1, %v113_v32, 0  ;;  %v181_v36 = vsel %vm102_vm11, 1, %v409_v2  ;;  %v182_v37 = vsel %vm103_vm12, 1, %v409_v2  ;;  %v147_v14 = vld [vmem:[#allocation3] sm:$0x3] }
  0x18   :  { %v157_v38 = vadd.s32 %v156_v30, %v155_v25  ;;  %v167_v39 = vrot.slane %v166_v31, 4  ;;  %vm109_vm3 = vmand %vm97_vm6, %vm103_vm12  ;;  %v115_v40 = vsel %vm108_vm2, 1, %v409_v2  ;;  %v183_v41 = vsel %vm104_vm14, 1, %v409_v2  ;;  %s243_s9 = sshll.u32 %s412_s8, 4  ;;  %s245_s12 = sshll.u32 %s530_s4, 4  ;;  %s244_s9 = int_to_ptr.vmem [resolvable:$true] %s243_s9  ;;  %s246_s12 = int_to_ptr.hbm [resolvable:$true] %s245_s12 }
  0x19   :  { %vm534_vm4 = vcmp.ge.f32.partialorder %v86_v8, 0.0  ;;  %v116_v42 = vsel %vm109_vm3, 1, %v409_v2  ;;  %v128_v43 = vsel %vm126_vm1, %v115_v40, 0  ;;  %v184_v44 = vadd.s32 %v182_v37, %v178_v28 }
  0x1a   :  { %vm110_vm5 = vmand %vm534_vm4, %vm104_vm14  ;;  %v192_v45 = vsel %vm126_vm1, %v179_v29, 0  ;;  %v158_v46 = vrot.slane %v157_v38, 2  ;;  %v168_v47 = vadd.s32 %v167_v39, %v166_v31  ;;  %v118_v49 = vadd.s32 %v116_v42, %v112_v27  ;;  %v111_v31 = vld [vmem:[#allocation2] sm:$0x3] }
  0x1b   :  { %v117_v48 = vsel %vm110_vm5, 1, %v409_v2  ;;  %v185_v51 = vadd.s32 %v184_v44, %v180_v33  ;;  %v193_v52 = vsel %vm126_vm1, %v181_v36, 0  ;;  %v194_v53 = vsel %vm126_vm1, %v183_v41, 0  ;;  %v177_v33 = vld [vmem:[#allocation4] sm:$0x3] }
  0x1c   :  { %v129_v50 = vsel %vm126_vm1, %v117_v48, 0  ;;  %v159_v54 = vadd.s32 %v158_v46, %v157_v38  ;;  %v169_v55 = vrot.slane %v168_v47, 2  ;;  %v119_v56 = vadd.s32 %v118_v49, %v114_v34 }
  0x1d   :  { %v130_v57 = vadd.s32 %v129_v50, %v127_v35  ;;  %v186_v58 = vrot.slane %v185_v51, 4  ;;  %v195_v59 = vadd.s32 %v194_v53, %v192_v45  ;;  %vm139_vm1 = vcmask 1040384  }
  0x1e   :  { %v160_v60 = vrot.slane %v159_v54, 1  ;;  %v170_v61 = vadd.s32 %v169_v55, %v168_v47  ;;  %v120_v62 = vrot.slane %v119_v56, 4 }
  0x1f   :  { %v131_v63 = vadd.s32 %v130_v57, %v128_v43  ;;  %v187_v0 = vadd.s32 %v186_v58, %v185_v51  ;;  %v196_v2 = vadd.s32 %v195_v59, %v193_v52 }
  0x20   :  { %v171_v3 = vrot.slane %v170_v61, 1  ;;  %v121_v4 = vadd.s32 %v120_v62, %v119_v56  ;;  %v161_v8 = vadd.s32 %v160_v60, %v159_v54 }
  0x21   :  { %v132_v5 = vrot.slane %v131_v63, 4  ;;  %v188_v6 = vrot.slane %v187_v0, 2  ;;  %v197_v7 = vrot.slane %v196_v2, 4 }
  0x22   :  { %v172_v9 = vadd.s32 %v171_v3, %v170_v61  ;;  %v122_v10 = vrot.slane %v121_v4, 2 }
  0x23   :  { %v133_v11 = vadd.s32 %v132_v5, %v131_v63  ;;  %v189_v12 = vadd.s32 %v188_v6, %v187_v0  ;;  %v198_v13 = vadd.s32 %v197_v7, %v196_v2 }
  0x24   :  { %v173_v15 = vrot.slane %v172_v9, 7  ;;  %v123_v16 = vadd.s32 %v122_v10, %v121_v4 }
  0x25   :  { %v134_v17 = vrot.slane %v133_v11, 2  ;;  %v199_v18 = vrot.slane %v198_v13, 2  ;;  %v190_v23 = vrot.slane %v189_v12, 1 }
  0x26   :  { %v174_v19 = vsel %vm139_vm1, %v161_v8, %v173_v15  ;;  %v124_v20 = vrot.slane %v123_v16, 1 }
  0x27   :  { %v135_v21 = vadd.s32 %v134_v17, %v133_v11  ;;  %v175_v22 = vadd.s32 %v174_v19, %v147_v14  ;;  %v200_v24 = vadd.s32 %v199_v18, %v198_v13  ;;  %v191_v29 = vadd.s32 %v190_v23, %v189_v12 }
  0x28   :  { %v125_v27 = vadd.s32 %v124_v20, %v123_v16 }
  0x29   :  { %v136_v25 = vrot.slane %v135_v21, 1  ;;  %176 = vst.msk [vmem:[#allocation3] sm:$0x3] %vm444_vm0, %v175_v22  ;;  %v201_v26 = vrot.slane %v200_v24, 1 }
  0x2b   :  { %v137_v28 = vadd.s32 %v136_v25, %v135_v21  ;;  %v202_v30 = vadd.s32 %v201_v26, %v200_v24 }
  0x2d   :  { %v138_v32 = vrot.slane %v137_v28, 7  ;;  %v203_v34 = vrot.slane %v202_v30, 7 }
  0x2f   :  { %v140_v35 = vsel %vm139_vm1, %v125_v27, %v138_v32  ;;  %v204_v37 = vsel %vm139_vm1, %v191_v29, %v203_v34 }
  0x30   :  { %v141_v36 = vadd.s32 %v140_v35, %v111_v31  ;;  %v205_v38 = vadd.s32 %v204_v37, %v177_v33  ;;  %v212_v39 = vld [vmem:[#allocation3] sm:$0x3] }
  0x31   :  { %213 = vst.msk [vmem:[#allocation11] sm:$0x3] %vm444_vm0, %v212_v39 }
  0x32   :  { %146 = vst.msk [vmem:[#allocation2] sm:$0x3] %vm444_vm0, %v141_v36  ;;  %237 = dma.vmem_to_hbm [thread:$0]  %s233_s1, 32, %s235_s29, [#allocation12]  }
  0x33   :  { %206 = vst.msk [vmem:[#allocation4] sm:$0x3] %vm444_vm0, %v205_v38 }
  0x39   :  { %v210_v40 = vld [vmem:[#allocation2] sm:$0x3] }
  0x3a   :  { %211 = vst.msk [vmem:[#allocation10] sm:$0x3] %vm444_vm0, %v210_v40  ;;  %v214_v41 = vld [vmem:[#allocation4] sm:$0x3] }
  0x3b   :  { %215 = vst.msk [vmem:[#allocation13] sm:$0x3] %vm444_vm0, %v214_v41  ;;  %226 = dma.vmem_to_hbm [thread:$0]  %s222_s5, 32, %s224_s7, [#allocation7]  }
  0x3c   :  { %248 = dma.vmem_to_hbm [thread:$0]  %s244_s9, 32, %s246_s12, [#allocation12]  }
  0x3d   :  { %401 = dma.done.wait [#allocation7], 32  }
  0x3e   :  { %402 = vsyncadd [#allocation7], 4294967264 }
  0x3f   :  { %403 = dma.done.wait [#allocation12], 64  }
  0x40   :  { %404 = vsyncadd [#allocation12], 4294967232 }
  0x41   :  { %261 = vsyncpa [#allocation6], 1 }
  0x42   :  { %262 = vsyncpa [#allocation9], 1 }
  0x43   :  { %263 = vsyncpa [#allocation7], 1 }
  0x44   :  { %264 = vsyncpa [#allocation12], 1 }

</bundles_post_ra>
